<compile_context>
chip_gen: v7x
topology: tpu7x:2x2x1
jax: 0.10.0
libtpu: 0.0.40
codegen_flags: <defaults>
</compile_context>

<pallas_src>
import functools

import jax
import jax.numpy as jnp
from jax.experimental import pallas as pl
from jax.experimental.pallas import tpu as pltpu


def _ffn_kernel(x_ref, w_ref, b_ref, o_ref, acc_ref):
    # x_ref: (tb, tk) bf16   w_ref: (tn, tk) bf16 (PyTorch Linear layout)
    # b_ref: (1, tn) f32     o_ref: (tb, tn)       acc_ref: (tb, tn) f32
    k = pl.program_id(2)

    @pl.when(k == 0)
    def _():
        acc_ref[...] = jnp.zeros_like(acc_ref)

    # Contract the shared K axis (last axis of both operands) -> (tb, tn).
    # This consumes the (N, K) PyTorch weight directly; no HBM transpose.
    acc_ref[...] += jax.lax.dot_general(
        x_ref[...], w_ref[...],
        dimension_numbers=(((1,), (1,)), ((), ())),
        preferred_element_type=jnp.float32)

    # Epilogue only after the full K reduction.
    @pl.when(k == pl.num_programs(2) - 1)
    def _():
        o_ref[...] = jnp.maximum(acc_ref[...] + b_ref[...], 0.0).astype(o_ref.dtype)


def _round_up(x, m):
    return ((x + m - 1) // m) * m


def _pick_tile(dim, candidates):
    for c in candidates:
        if dim >= c and dim % c == 0:
            return c
    return dim  # fall back to the full (untiled) extent


@functools.partial(jax.jit, static_argnames=("compute_dtype",))
def feed_forward_block(x, weight, bias, *, compute_dtype=jnp.bfloat16):
    """Equivalent of FeedForwardBlock.forward(x) = relu(x @ weight.T + bias).

    x:      (B, input_dim)
    weight: (output_dim, input_dim)   (PyTorch nn.Linear layout, NOT transposed)
    bias:   (output_dim,)
    """
    B, K = x.shape
    N, K2 = weight.shape
    assert K == K2 and bias.shape == (N,)
    out_dtype = x.dtype

    # ---- tile selection (MXU / lane aligned) --------------------------------
    if B >= 256:
        tb = 256
    else:
        tb = max(_round_up(B, 8), 8)
    Bp = _round_up(B, tb)

    tn = _pick_tile(N, (512, 256, 128))
    tk = _pick_tile(K, (512, 256, 128))

    # ---- cheap glue (no weight transpose materialization) -------------------
    if Bp != B:
        x = jnp.pad(x, ((0, Bp - B), (0, 0)))
    x_c = x.astype(compute_dtype)
    w_c = weight.astype(compute_dtype)
    b2d = bias.reshape(1, N).astype(jnp.float32)

    grid = (Bp // tb, N // tn, pl.cdiv(K, tk))

    # ---- explicit VMEM budget from the chosen tiles --------------------------
    cbytes = jnp.dtype(compute_dtype).itemsize
    obytes = jnp.dtype(out_dtype).itemsize
    needed = (2 * tb * tk * cbytes      # x tile (double-buffered)
              + 2 * tn * tk * cbytes    # weight tile (double-buffered)
              + 2 * tn * 4              # bias tile
              + 2 * tb * tn * obytes    # output tile
              + tb * tn * 4)            # f32 accumulator scratch
    vmem_limit = int(min(max(2 * needed, 32 * 1024 * 1024), 48 * 1024 * 1024))

    out = pl.pallas_call(
        _ffn_kernel,
        out_shape=jax.ShapeDtypeStruct((Bp, N), out_dtype),
        grid_spec=pltpu.PrefetchScalarGridSpec(
            num_scalar_prefetch=0,
            grid=grid,
            in_specs=[
                pl.BlockSpec((tb, tk), lambda i, j, k: (i, k)),   # x tile
                pl.BlockSpec((tn, tk), lambda i, j, k: (j, k)),   # weight tile (N, K)
                pl.BlockSpec((1, tn), lambda i, j, k: (0, j)),    # bias tile
            ],
            out_specs=pl.BlockSpec((tb, tn), lambda i, j, k: (i, j)),
            scratch_shapes=[pltpu.VMEM((tb, tn), jnp.float32)],
        ),
        compiler_params=pltpu.CompilerParams(
            dimension_semantics=("parallel", "parallel", "arbitrary"),
            vmem_limit_bytes=vmem_limit,
        ),
    )(x_c, w_c, b2d)

    return out[:B] if Bp != B else out


if __name__ == "__main__":
    key = jax.random.PRNGKey(0)
    k_x, k_w, k_b = jax.random.split(key, 3)

    # Small shapes that still exercise the N- and K-tiling grid axes.
    batch, input_dim, output_dim = 16, 384, 384

    # Deterministic params mimicking nn.Linear's U(-1/sqrt(in), 1/sqrt(in)).
    bound = 1.0 / (input_dim ** 0.5)
    weight = jax.random.uniform(k_w, (output_dim, input_dim),
                                minval=-bound, maxval=bound, dtype=jnp.float32)
    bias = jax.random.uniform(k_b, (output_dim,),
                              minval=-bound, maxval=bound, dtype=jnp.float32)
    x = jax.random.normal(k_x, (batch, input_dim), dtype=jnp.float32)

    out = jax.block_until_ready(feed_forward_block(x, weight, bias))
    assert out.shape == (batch, output_dim)

    # Reference with matching bf16-operand / f32-accumulate numerics.
    ref_bf16 = jnp.maximum(
        jnp.dot(x.astype(jnp.bfloat16), weight.astype(jnp.bfloat16).T,
                preferred_element_type=jnp.float32) + bias, 0.0).astype(x.dtype)
    assert jnp.allclose(out, ref_bf16, atol=1e-4, rtol=1e-3), \
        float(jnp.max(jnp.abs(out - ref_bf16)))

    # Loose check against the pure-f32 module semantics (bf16 rounding slack).
    ref_f32 = jnp.maximum(x @ weight.T + bias, 0.0)
    assert jnp.allclose(out, ref_f32, atol=6e-2, rtol=5e-2)

    print("KERNEL_OK")
</pallas_src>

<mosaic_0001>
module attributes {stable_mosaic.version = 11 : i64} {
  func.func @_ffn_kernel(%arg0: i32, %arg1: i32, %arg2: i32, %arg3: memref<16x128xbf16, #tpu.memory_space<vmem>>, %arg4: memref<128x128xbf16, #tpu.memory_space<vmem>>, %arg5: memref<1x128xf32, #tpu.memory_space<vmem>>, %arg6: memref<16x128xf32, #tpu.memory_space<vmem>>, %arg7: memref<16x128xf32, #tpu.memory_space<vmem>>) attributes {dimension_semantics = [#tpu.dimension_semantics<parallel>, #tpu.dimension_semantics<parallel>, #tpu.dimension_semantics<arbitrary>], iteration_bounds = array<i64: 1, 3, 3>, scalar_prefetch = 0 : i64, scratch_operands = 1 : i64, tpu.core_type = #tpu.core_type<tc>, window_params = [{transform_indices = @transform_0, window_bounds = array<i64: 16, 128>}, {transform_indices = @transform_1, window_bounds = array<i64: 128, 128>}, {transform_indices = @transform_2, window_bounds = array<i64: 1, 128>}, {transform_indices = @transform_3, window_bounds = array<i64: 16, 128>}]} {
    %c0_i32 = arith.constant 0 : i32
    %0 = arith.cmpi eq, %arg2, %c0_i32 : i32
    %1 = arith.extui %0 : i1 to i32
    %c0_i32_0 = arith.constant 0 : i32
    %2 = arith.cmpi ne, %1, %c0_i32_0 : i32
    scf.if %2 {
      %cst_9 = arith.constant 0.000000e+00 : f32
      %12 = vector.broadcast %cst_9 : f32 to vector<16x128xf32>
      %c0_10 = arith.constant 0 : index
      %c0_11 = arith.constant 0 : index
      %13 = vector.load %arg7[%c0_10, %c0_11] : memref<16x128xf32, #tpu.memory_space<vmem>>, vector<16x128xf32>
      tpu.vector_store %arg7[%c0_10, %c0_11], %12 {strides = array<i32>} : memref<16x128xf32, #tpu.memory_space<vmem>>, vector<16x128xf32>,
    } else {
    }
    %c0 = arith.constant 0 : index
    %c0_1 = arith.constant 0 : index
    %3 = vector.load %arg7[%c0, %c0_1] : memref<16x128xf32, #tpu.memory_space<vmem>>, vector<16x128xf32>
    %c0_2 = arith.constant 0 : index
    %c0_3 = arith.constant 0 : index
    %4 = vector.load %arg3[%c0_2, %c0_3] : memref<16x128xbf16, #tpu.memory_space<vmem>>, vector<16x128xbf16>
    %c0_4 = arith.constant 0 : index
    %c0_5 = arith.constant 0 : index
    %5 = vector.load %arg4[%c0_4, %c0_5] : memref<128x128xbf16, #tpu.memory_space<vmem>>, vector<128x128xbf16>
    %cst = arith.constant dense<0.000000e+00> : vector<16x128xf32>
    %6 = tpu.matmul %4, %5, %cst {dimension_numbers = #tpu.dot_dimension_numbers<[1], [1], [0], [0], [0, 0, 1, 0], [], []>} : vector<16x128xbf16>, vector<128x128xbf16>, vector<16x128xf32> -> vector<16x128xf32>
    %7 = arith.addf %3, %6 : vector<16x128xf32>
    %c0_6 = arith.constant 0 : index
    %c0_7 = arith.constant 0 : index
    %8 = vector.load %arg7[%c0_6, %c0_7] : memref<16x128xf32, #tpu.memory_space<vmem>>, vector<16x128xf32>
    tpu.vector_store %arg7[%c0_6, %c0_7], %7 {strides = array<i32>} : memref<16x128xf32, #tpu.memory_space<vmem>>, vector<16x128xf32>,
    %c2_i32 = arith.constant 2 : i32
    %9 = arith.cmpi eq, %arg2, %c2_i32 : i32
    %10 = arith.extui %9 : i1 to i32
    %c0_i32_8 = arith.constant 0 : i32
    %11 = arith.cmpi ne, %10, %c0_i32_8 : i32
    scf.if %11 {
      %c0_9 = arith.constant 0 : index
      %c0_10 = arith.constant 0 : index
      %12 = vector.load %arg7[%c0_9, %c0_10] : memref<16x128xf32, #tpu.memory_space<vmem>>, vector<16x128xf32>
      %c0_11 = arith.constant 0 : index
      %c0_12 = arith.constant 0 : index
      %13 = vector.load %arg5[%c0_11, %c0_12] : memref<1x128xf32, #tpu.memory_space<vmem>>, vector<1x128xf32>
      %14 = vector.broadcast %13 : vector<1x128xf32> to vector<16x128xf32>
      %15 = arith.addf %12, %14 : vector<16x128xf32>
      %cst_13 = arith.constant 0.000000e+00 : f32
      %16 = vector.broadcast %cst_13 : f32 to vector<16x128xf32>
      %17 = arith.maximumf %15, %16 : vector<16x128xf32>
      %c0_14 = arith.constant 0 : index
      %c0_15 = arith.constant 0 : index
      %18 = vector.load %arg6[%c0_14, %c0_15] : memref<16x128xf32, #tpu.memory_space<vmem>>, vector<16x128xf32>
      tpu.vector_store %arg6[%c0_14, %c0_15], %17 {strides = array<i32>} : memref<16x128xf32, #tpu.memory_space<vmem>>, vector<16x128xf32>,
    } else {
    }
    return
  }
  func.func @transform_0(%arg0: i32, %arg1: i32, %arg2: i32) -> (i32, i32) {
    %c0_i32 = arith.constant 0 : i32
    return %arg0, %arg2 : i32, i32
  }
  func.func @transform_1(%arg0: i32, %arg1: i32, %arg2: i32) -> (i32, i32) {
    %c0_i32 = arith.constant 0 : i32
    return %arg1, %arg2 : i32, i32
  }
  func.func @transform_2(%arg0: i32, %arg1: i32, %arg2: i32) -> (i32, i32) {
    %c0_i32 = arith.constant 0 : i32
    %c0_i32_0 = arith.constant 0 : i32
    return %c0_i32, %arg1 : i32, i32
  }
  func.func @transform_3(%arg0: i32, %arg1: i32, %arg2: i32) -> (i32, i32) {
    %c0_i32 = arith.constant 0 : i32
    return %arg0, %arg1 : i32, i32
  }
}

</mosaic_0001>

<bundles_post_ra>
// kernel: feed_forward_block.1
= control target key start
LH: loop header
LB: loop body
LE: loop exit
PB: predicated region body
PF: predicated region fallthrough
CT: control target
= control target key end

     0   :  { %8 = vsyncpa [#allocation6], 0  ;;  %s1252_s0 = inlined_call_operand.vmem [shape: bf16[16,384], index: 0, kind: input, shape index: {}]   ;;  %s1253_s1 = inlined_call_operand.vmem [shape: bf16[384,384], index: 1, kind: input, shape index: {}]   ;;  %s1254_s2 = inlined_call_operand.vmem [shape: f32[1,384], index: 2, kind: input, shape index: {}]   ;;  %s1255_s3 = inlined_call_operand.hbm [shape: f32[16,384], index: 3, kind: output, shape index: {}]  }
   0x1   :  { %10 = vsyncpa [#allocation6 + $0x1], 0  ;;  %s992_s12 = smov 0   ;;  %s994_s13 = smov 0  }
   0x2   :  { %s996_s14 = smov 0   ;;  %s998_s15 = smov 0  }
   0x3   :  { %s1000_s16 = smov 0   ;;  %s1002_s17 = smov 0  }
   0x4   :  { %s1004_s18 = smov 0   ;;  %s1006_s19 = smov 0  }
   0x5   :  { %s1008_s20 = smov 0   ;;  %s1010_s21 = smov 0  }
   0x6   :  { %s1012_s22 = smov 0   ;;  %s1014_s23 = smov 0  }
   0x7 LB: > { %1259 = sst [smem:[#allocation8_spill]] %s943_s18  ;;  %s659_s24 = sadd.s32 4294967295, %s963_s23   ;;  %s963_s23 = sphi %s1014_s23, %s16_s23   ;;  %s959_s22 = sphi %s1012_s22, %s1281_s22   ;;  %s955_s21 = sphi %s1010_s21, %s1280_s21   ;;  %s951_s20 = sphi %s1008_s20, %s1279_s20   ;;  %s947_s19 = sphi %s1006_s19, %s1278_s19   ;;  %s943_s18 = sphi %s1004_s18, %s1270_s18   ;;  %s939_s17 = sphi %s1002_s17, %s1269_s17   ;;  %s935_s16 = sphi %s1000_s16, %s1277_s16   ;;  %s931_s15 = sphi %s998_s15, %s1276_s15   ;;  %s927_s14 = sphi %s996_s14, %s1275_s14   ;;  %s923_s13 = sphi %s994_s13, %s1274_s13   ;;  %s919_s12 = sphi %s992_s12, %s1273_s12  }
   0x8   : > { %s660_s25 = sadd.s32 4294967294, %s963_s23   ;;  %s28_s26 = sadd.s32 1, %s955_s21 }
   0x9   : > { %s31_s27 = sadd.s32 1, %s959_s22  ;;  %p29_p0 = scmp.ge.s32.totalorder %s28_s26, 3 }
   0xa   : > { %s44_s28 = sadd.s32 1, %s943_s18  ;;  %p51_p1 = scmp.ne.s32.totalorder %s943_s18, %s939_s17 }
   0xb   : > { %p52_p2 = scmp.eq.s32.totalorder %s963_s23, 0  ;;  %s1283_s26 = smov (%p29_p0, %s28_s26), 0 }
   0xc   : > { %1260 = sst [smem:[#allocation9_spill]] %s1283_s26  ;;  %s1285_s27 = smov (!%p29_p0, %s31_s27), %s959_s22 }
   0xd   : > { %s40_s29 = ssub.s32 %s955_s21, %s1283_s26  ;;  %p1065_p3 = por %p52_p2, %p51_p1 }
   0xe   : > { %p33_p4 = scmp.ge.s32.totalorder %s1285_s27, 3  ;;  %p42_p5 = scmp.eq.s32.totalorder %s40_s29, 0 }
   0xf   : > { %s72_s4 = sadd.s32 1, %s935_s16  ;;  %p79_p6 = scmp.ne.s32.totalorder %s935_s16, %s931_s15 }
  0x10   : > { %s1287_s27 = smov (%p33_p4, %s1285_s27), 0  ;;  %s126_s9 = sadd.s32 1, %s927_s14 }
  0x11   : > { %1262 = sst [smem:[#allocation10_spill]] %s1287_s27  ;;  %s67_s6 = ssub.s32 %s959_s22, %s1287_s27 }
  0x12   : > { %s1075_s5 = scalar_select %p42_p5, %s943_s18, %s44_s28  }
  0x13   : > { %p1079_p7 = por %p79_p6, %p52_p2  ;;  %s69_s8 = sor.u32 %s67_s6, %s40_s29 }
  0x14   : > { %1263 = sst [smem:[#allocation11_spill]] %s1075_s5  ;;  %p124_p8 = scmp.eq.s32.totalorder %s67_s6, 0 }
  0x15   : > { %p70_p9 = scmp.eq.s32.totalorder %s69_s8, 0  ;;  %p136_p10 = scmp.ne.s32.totalorder %s927_s14, %s923_s13 }
  0x16   : > { %s1085_s10 = scalar_select %p124_p8, %s927_s14, %s126_s9  }
  0x17   : > { %s1088_s11 = scalar_select %p70_p9, %s935_s16, %s72_s4  }
  0x18   : > { %p137_p11 = scmp.eq.s32.totalorder %s659_s24, 8  ;;  %p142_p12 = scmp.ne.s32.totalorder %s923_s13, %s919_s12 }
  0x19   : > { %1265 = sst [smem:[#allocation12_spill]] %s1088_s11  ;;  %p143_p13 = scmp.eq.s32.totalorder %s660_s25, 8 }
  0x1a   : > { %p1094_p0 = por %p137_p11, %p136_p10  ;;  %p662_p2 = scmp.ge.s32.totalorder %s963_s23, 9 }
  0x1b   : > { %p1098_p1 = por %p143_p13, %p142_p12 }
  0x1c   : > { %159 = sbr.rel (%p662_p2) target bundleno = 59 (0x3b), region = 16 }
  0x23   : > { %162 = sbr.rel (!%p1065_p3) target bundleno = 42 (0x2a), region = 20  ;;  %s164_s29 = sand.u32 (%p1065_p3), 1, %s943_s18  }
  0x24   : > { %s664_s24 = sshll.u32 (%p1065_p3), %s955_s21, 2  ;;  %s663_s4 = sshll.u32 (%p1065_p3), %s164_s29, 3 }
  0x25   : > { %s171_s8 = scalar_lea.vmem (%p1065_p3), %s1252_s0, %s664_s24  ;;  %s166_s9 = scalar_lea.vmem (%p1065_p3), [#allocation3], %s663_s4 }
  0x26   : > { %v187_v0 = vld [vmem:[%s171_s8] sm:$0xf] (%p1065_p3)  ;;  %v189_v1 = vld [vmem:[%s171_s8 + $0xc] sm:$0xf] (%p1065_p3) }
  0x27   : > { %188 = vst [vmem:[%s166_s9] sm:$0xf] (%p1065_p3), %v187_v0  ;;  %190 = vst [vmem:[%s166_s9 + $0x4] sm:$0xf] (%p1065_p3), %v189_v1 }
  0x2a PF: > { %217 = sbr.rel (!%p1079_p7) target bundleno = 59 (0x3b), region = 61  ;;  %s219_s30 = sand.u32 (%p1079_p7), 1, %s935_s16  }
  0x2b   : > { %s718_s26 = smul.u32 (%p1079_p7), 48, %s959_s22  ;;  %s665_s5 = sshll.u32 (%p1079_p7), %s219_s30, 6 }
  0x2c   : > { %s221_s7 = scalar_lea.vmem (%p1079_p7), [#allocation4], %s665_s5 }
  0x2d   : > { %s224_s29 = sadd.s32 (%p1079_p7), %s955_s21, %s718_s26 }
  0x2e   : > { %s668_s18 = sshll.u32 (%p1079_p7), %s224_s29, 2 }
  0x2f   : > { %s1118_s24 = scalar_lea.vmem (%p1079_p7), %s1253_s1, %s668_s18 }
  0x30   : > { %v242_v2 = vld [vmem:[%s1118_s24] sm:$0xf] (%p1079_p7)  ;;  %v244_v3 = vld [vmem:[%s1118_s24 + $0xc] sm:$0xf] (%p1079_p7)  ;;  %v246_v4 = vld [vmem:[%s1118_s24 + $0x18] sm:$0xf] (%p1079_p7) }
  0x31   : > { %243 = vst [vmem:[%s221_s7] sm:$0xf] %v242_v2  ;;  %245 = vst [vmem:[%s221_s7 + $0x4] sm:$0xf] %v244_v3  ;;  %v248_v5 = vld [vmem:[%s1118_s24 + $0x24] sm:$0xf] }
  0x32   : > { %247 = vst [vmem:[%s221_s7 + $0x8] sm:$0xf] %v246_v4  ;;  %v250_v6 = vld [vmem:[%s1118_s24 + $0x30] sm:$0xf]  ;;  %v252_v7 = vld [vmem:[%s1118_s24 + $0x3c] sm:$0xf] }
  0x33   : > { %249 = vst [vmem:[%s221_s7 + $0xc] sm:$0xf] %v248_v5  ;;  %251 = vst [vmem:[%s221_s7 + $0x10] sm:$0xf] %v250_v6  ;;  %v254_v8 = vld [vmem:[%s1118_s24 + $0x48] sm:$0xf] }
  0x34   : > { %253 = vst [vmem:[%s221_s7 + $0x14] sm:$0xf] %v252_v7  ;;  %v256_v9 = vld [vmem:[%s1118_s24 + $0x54] sm:$0xf]  ;;  %v258_v10 = vld [vmem:[%s1118_s24 + $0x60] sm:$0xf] }
  0x35   : > { %255 = vst [vmem:[%s221_s7 + $0x18] sm:$0xf] %v254_v8  ;;  %257 = vst [vmem:[%s221_s7 + $0x1c] sm:$0xf] %v256_v9  ;;  %v260_v11 = vld [vmem:[%s1118_s24 + $0x6c] sm:$0xf] }
  0x36   : > { %259 = vst [vmem:[%s221_s7 + $0x20] sm:$0xf] %v258_v10  ;;  %v262_v12 = vld [vmem:[%s1118_s24 + $0x78] sm:$0xf]  ;;  %v264_v13 = vld [vmem:[%s1118_s24 + $0x84] sm:$0xf] }
  0x37   : > { %261 = vst [vmem:[%s221_s7 + $0x24] sm:$0xf] %v260_v11  ;;  %263 = vst [vmem:[%s221_s7 + $0x28] sm:$0xf] %v262_v12  ;;  %v266_v14 = vld [vmem:[%s1118_s24 + $0x90] sm:$0xf] }
  0x38   : > { %265 = vst [vmem:[%s221_s7 + $0x2c] sm:$0xf] %v264_v13  ;;  %v268_v15 = vld [vmem:[%s1118_s24 + $0x9c] sm:$0xf]  ;;  %v270_v16 = vld [vmem:[%s1118_s24 + $0xa8] sm:$0xf] }
  0x39   : > { %267 = vst [vmem:[%s221_s7 + $0x30] sm:$0xf] %v266_v14  ;;  %269 = vst [vmem:[%s221_s7 + $0x34] sm:$0xf] %v268_v15  ;;  %v272_v17 = vld [vmem:[%s1118_s24 + $0xb4] sm:$0xf] }
  0x3a   : > { %271 = vst [vmem:[%s221_s7 + $0x38] sm:$0xf] %v270_v16  ;;  %273 = vst [vmem:[%s221_s7 + $0x3c] sm:$0xf] %v272_v17 }
  0x3b PF: > { %p669_p3 = scmp.ge.s32.totalorder %s963_s23, 1  ;;  %p333_p4 = scmp.lt.s32.totalorder %s963_s23, 10 }
  0x3d   : > { %p334_p5 = pnand %p669_p3, %p333_p4 }
  0x3e   : > { %s340_s18 = sand.u32 (!%p334_p5), 1, %s939_s17   ;;  %s347_s26 = sand.u32 (!%p334_p5), 1, %s931_s15  }
  0x3f   : > { %337 = sbr.rel (%p334_p5) target bundleno = 398 (0x18e), region = 106  ;;  %s1140_s5 = sshll.u32 (!%p334_p5), %s340_s18, 3 }
  0x40   : > { %s671_s11 = sshll.u32 (!%p334_p5), %s347_s26, 6  ;;  %s374_s4 = sand.u32 (!%p334_p5), 1, %s923_s13  }
  0x41   : > { %p379_p6 = scmp.lt.s32.totalorder (!%p334_p5), %s951_s20, 2  ;;  %s672_s6 = sshll.u32 (!%p334_p5), %s374_s4, 4 }
  0x42   : > { %s342_s25 = scalar_lea.vmem (!%p334_p5), [#allocation3], %s1140_s5  ;;  %s1154_s24 = scalar_lea.vmem (!%p334_p5), [#allocation4], %s671_s11 }
  0x43   : > { %s1156_s17 = scalar_lea.vmem (!%p334_p5), [#allocation5], %s672_s6  ;;  %p673_p7 = scmp.ne.s32.totalorder (!%p334_p5), %s947_s19, 0 }
  0x46   : > { %s1147_s8 = scalar_select %p379_p6, %s951_s20, 2 }
  0x47   : > { %387 = sbr.rel (%p673_p7) target bundleno = 78 (0x4e), region = 118  ;;  %v965_v18 = vmov (!%p673_p7), 0.0  }
  0x48   : > { %s381_s29 = scalar_lea.vmem %s1254_s2, %s1147_s8  ;;  %388 = vst [vmem:[#allocation2] sm:$0xff] (!%p673_p7), %v965_v18  ;;  %389 = vst [vmem:[#allocation2 + $0x8] sm:$0xff] (!%p673_p7), %v965_v18 }
  0x4e PF: > { %v828_v19 = vld [vmem:[%s1154_s24] sm:$0xff]   ;;  %v966_v20 = vmov 0.0   ;;  %vm967_vm0 = vmmov 0   ;;  %v829_v21 = vld [vmem:[%s1154_s24 + $0x8] sm:$0xff]   ;;  %v830_v22 = vld [vmem:[%s1154_s24 + $0x10] sm:$0xff]   ;;  %p683_p8 = scmp.ne.s32.totalorder %s947_s19, 2 }
  0x4f   : > { %698 = vmatprep.subr.bf16.mxu0 %v966_v20  ;;  %714 = vmatprep.mubr.msk.bf16.mxu0 %vm967_vm0, %v966_v20  ;;  %v831_v23 = vld [vmem:[%s1154_s24 + $0x18] sm:$0xff]   ;;  %v832_v24 = vld [vmem:[%s1154_s24 + $0x20] sm:$0xff]   ;;  %v833_v25 = vld [vmem:[%s1154_s24 + $0x28] sm:$0xff]  }
  0x50   : > { %699 = vmatpush3.bf16.xpose.msra.mxu0 %v828_v19  ;;  %v834_v26 = vld [vmem:[%s1154_s24 + $0x30] sm:$0xff]   ;;  %v835_v27 = vld [vmem:[%s1154_s24 + $0x38] sm:$0xff]   ;;  %v390_v29 = vld [vmem:[#allocation2] sm:$0xff] }
  0x51   : > { %700 = vmatprep.subr.bf16.mxu0 %v966_v20  ;;  %v836_v28 = vld [vmem:[%s342_s25] sm:$0xff]   ;;  %v391_v31 = vld [vmem:[#allocation2 + $0x8] sm:$0xff]  ;;  %v684_v38 = vld [vmem:[%s381_s29] ss:$0 sm:$0xff] (!%p683_p8) }
  0x58   : > { %701 = vmatpush3.bf16.xpose.msra.mxu0 %v829_v21 }
  0x59   : > { %702 = vmatprep.subr.bf16.mxu0 %v966_v20 }
  0x60   : > { %703 = vmatpush3.bf16.xpose.msra.mxu0 %v830_v22 }
  0x61   : > { %704 = vmatprep.subr.bf16.mxu0 %v966_v20 }
  0x68   : > { %705 = vmatpush3.bf16.xpose.msra.mxu0 %v831_v23 }
  0x69   : > { %706 = vmatprep.subr.bf16.mxu0 %v966_v20 }
  0x70   : > { %707 = vmatpush3.bf16.xpose.msra.mxu0 %v832_v24 }
  0x71   : > { %708 = vmatprep.subr.bf16.mxu0 %v966_v20 }
  0x78   : > { %709 = vmatpush3.bf16.xpose.msra.mxu0 %v833_v25 }
  0x79   : > { %710 = vmatprep.subr.bf16.mxu0 %v966_v20 }
  0x80   : > { %711 = vmatpush3.bf16.xpose.msra.mxu0 %v834_v26 }
  0x81   : > { %712 = vmatprep.subr.bf16.mxu0 %v966_v20 }
  0x88   : > { %713 = vmatpush3.bf16.xpose.msra.mxu0 %v835_v27 }
  0x8f   : > { %715 = vmatmul.mubr.bf16.vlgmr.msra.gmra.mrb[0].mxu0 %v836_v28 }
 0x161   : > { %512 = sbr.rel (%p683_p8) target bundleno = 372 (0x174), region = 122 }
 0x162   : > { %v498_v30 = vpop.f32.mrb[0].mxu0 }
 0x163   : > { %v505_v32 = vadd.f32 %v498_v30, %v390_v29  ;;  %v716_v33 = vpop.f32.mrb[1].mxu0 }
 0x164   : > { %v501_v34 = vpop.f32.mrb[2].mxu0 }
 0x165   : > { %507 = vst [vmem:[#allocation2] sm:$0xff] %v505_v32  ;;  %v506_v35 = vadd.f32 %v501_v34, %v391_v31  ;;  %v717_v36 = vpop.f32.mrb[3].mxu0 }
 0x167   : > { %508 = vst [vmem:[#allocation2 + $0x8] sm:$0xff] %v506_v35 }
 0x16c   : > { %v513_v37 = vld [vmem:[#allocation2] sm:$0xff] }
 0x16d   : > { %v522_v40 = vadd.f32 %v684_v38, %v513_v37 }
 0x16e   : > { %v514_v39 = vld [vmem:[#allocation2 + $0x8] sm:$0xff] }
 0x16f   : > { %v523_v41 = vadd.f32 %v684_v38, %v514_v39  ;;  %v524_v42 = vmax.f32 %v522_v40, 0.0 }
 0x171   : > { %v525_v43 = vmax.f32 %v523_v41, 0.0  ;;  %526 = vst [vmem:[%s1156_s17] sm:$0xff] %v524_v42 }
 0x173   : > { %527 = vst [vmem:[%s1156_s17 + $0x8] sm:$0xff] %v525_v43 }
 0x174 PF: > { %s686_s19 = sshll.u32 %s951_s20, 7  ;;  %s544_s11 = sshll.u32 %s1156_s17, 4  ;;  %s1184_s11 = int_to_ptr.vmem [resolvable:$true] %s544_s11 }
 0x175   : > { %s1181_s5 = scalar_lea.hbm %s1255_s3, %s686_s19  ;;  %s1188_s6 = scalar_lea.sflag [#allocation6], %s374_s4 }
 0x176   : > { %s837_s8 = scalar_lea.vmem %s1184_s11, 256  ;;  %s968_s20 = smov [#allocation5]  }
 0x177   : > { %p838_p9 = scmp.ne.s32.totalorder %s1184_s11, %s837_s8  ;;  %s841_s9 = sshll.u32 %s968_s20, 4  ;;  %s842_s9 = int_to_ptr.vmem [resolvable:$false] %s841_s9 }
 0x178   : > { %s843_s30 = scalar_lea.vmem %s842_s9, 512  ;;  %p844_p12 = scmp.lt.s32.totalorder %s1184_s11, %s842_s9 }
 0x179   : > { %p839_p10 = pnand %p838_p9, %p1094_p0  ;;  %p845_p13 = scmp.lt.s32.totalorder %s843_s30, %s837_s8 }
 0x17b   : > { %p840_p11 = pneg %p839_p10  ;;  %p846_p2 = por %p845_p13, %p844_p12 }
 0x17d   : > { %p847_p3 = pnand %p846_p2, %p840_p11 }
 0x17f   : > { %850 = shalt.err (!%p847_p3)
}
 0x180   : > { %s851_s4 = scalar_lea.hbm %s1181_s5, 256  ;;  %s855_s24 = scalar_lea.hbm %s1255_s3, 768 }
 0x181   : > { %p852_p4 = scmp.ne.s32.totalorder %s1181_s5, %s851_s4  ;;  %p856_p7 = scmp.lt.u32.totalorder %s1181_s5, %s1255_s3 }
 0x182   : > { %p857_p8 = scmp.lt.u32.totalorder %s855_s24, %s851_s4  ;;  %p859_p10 = scmp.lt.u32.totalorder %s851_s4, %s1181_s5 }
 0x183   : > { %p853_p5 = pnand %p852_p4, %p1094_p0 }
 0x184   : > { %p858_p9 = por %p857_p8, %p856_p7 }
 0x185   : > { %p854_p6 = pneg %p853_p5 }
 0x186   : > { %p860_p11 = por %p859_p10, %p858_p9 }
 0x188   : > { %p861_p12 = pnand %p860_p11, %p854_p6 }
 0x18a   : > { %864 = shalt.err (!%p861_p12)
}
 0x18b   : > { %s969_s7 = smov 128   ;;  %s970_s19 = smov 384  }
 0x18c   : > { %s971_s18 = smov 8  }
 0x18d   : > { %719 = dma.vmem_to_hbm [thread:$0]  (%p1094_p0), %s1184_s11, 256, %s1181_s5, %s1188_s6, %s969_s7, %s970_s19, %s971_s18  }
 0x18e PF: > { %p725_p13 = scmp.ge.s32.totalorder %s963_s23, 2  ;;  %s559_s26 = sand.u32 1, %s919_s12  }
 0x18f   : > { %s560_s8 = scalar_lea.sflag [#allocation6], %s559_s26 }
 0x190   : > { %p722_p2 = pnand %p725_p13, %p1098_p1 }
 0x192   : > { %914 = dma.done.wait (!%p722_p2), %s560_s8, 256  }
 0x193   : > { %916 = vsyncadd (!%p722_p2), %s560_s8, 4294967040  ;;  %s16_s23 = sadd.s32 1, %s963_s23   ;;  %s1268_s28 = sld [smem:[#allocation12_spill]] }
 0x194   : > { %p13_p3 = scmp.ge.s32.totalorder %s16_s23, 11   ;;  %s1269_s17 = sld [smem:[#allocation8_spill]] }
 0x195   : > { %s1270_s18 = sld [smem:[#allocation11_spill]]  ;;  %s1271_s5 = sld [smem:[#allocation9_spill]] }
 0x196   : > { %s1272_s11 = sld [smem:[#allocation10_spill]]  ;;  %s1273_s12 = smov %s923_s13 }
 0x197   : > { %s1274_s13 = smov %s927_s14  ;;  %s1275_s14 = smov %s1085_s10 }
 0x198   : > { %s1276_s15 = smov %s935_s16  ;;  %s1278_s19 = smov %s955_s21 }
 0x199   : > { %s1277_s16 = smov %s1268_s28  ;;  %s1279_s20 = smov %s959_s22 }
 0x19a   :  { %15 = sbr.rel (!%p13_p3) target bundleno = 7 (0x7), region = 173 }
 0x19b   : > { %s1280_s21 = smov %s1271_s5 }
 0x19c   : > { %s1281_s22 = smov %s1272_s11 }
 0x1a1   :  { %565 = vsyncpa [#allocation6], 1 }
 0x1a2   :  { %567 = vsyncpa [#allocation6 + $0x1], 1 }

</bundles_post_ra>
